<compile_context>
chip_gen: v6e
topology: v6e:2x2x1
jax: 0.10.0
libtpu: 0.0.40
codegen_flags: <defaults>
</compile_context>

<pallas_src>
import jax
import jax.numpy as jnp
from jax.experimental import pallas as pl
from jax.experimental.pallas import tpu as pltpu

_LANE = 128  # TPU lane width


def _round_up(n, m):
    return ((n + m - 1) // m) * m


def _mlp_logsoftmax_kernel(x_ref, w1_ref, b1_ref, w2_ref, b2_ref, o_ref):
    # Hidden layer: ReLU(x @ W1 + b1). bf16 x bf16 -> f32 accumulate on MXU.
    h = jnp.dot(x_ref[...], w1_ref[...], preferred_element_type=jnp.float32)
    h = jnp.maximum(h + b1_ref[...], 0.0)  # b1 is (1, Hp) -> broadcast over batch

    # Output layer: logits = h @ W2 + b2 (f32; this matmul is tiny).
    # Padded class columns of W2 are zero and their b2 entries are -1e30, so
    # they are numerically removed from the softmax normalizer below.
    logits = jnp.dot(h, w2_ref[...], preferred_element_type=jnp.float32)
    logits = logits + b2_ref[...]

    # Numerically-stable log_softmax along the (padded) class axis.  The
    # padded logits sit at ~-1e30: max() ignores them and exp() gives 0.
    m = jnp.max(logits, axis=-1, keepdims=True)
    shifted = logits - m
    lse = jnp.log(jnp.sum(jnp.exp(shifted), axis=-1, keepdims=True))
    o_ref[...] = (shifted - lse).astype(o_ref.dtype)


def neural_net_forward(x, w1, b1, w2, b2, *, block_b=512):
    """Forward pass of NeuralNet: log_softmax(relu(x @ w1 + b1) @ w2 + b2).

    x : [B, input_dim] f32 (already-averaged word embeddings)
    w1: [input_dim, hidden_dim]   b1: [hidden_dim]
    w2: [hidden_dim, n_classes]   b2: [n_classes]
    Returns log-probabilities [B, n_classes] in f32.
    """
    B, input_dim = x.shape
    hidden_dim = w1.shape[1]
    n_classes = w2.shape[1]

    # Pad feature dims up to the 128-lane width -> lane-dense matmuls + stores.
    in_p = _round_up(input_dim, _LANE)
    hid_p = _round_up(hidden_dim, _LANE)
    cls_p = _round_up(n_classes, _LANE)

    # Batch tile: large enough to pipeline x DMA against compute, but never
    # larger than the (8-aligned) batch itself.  Fits comfortably in VMEM on
    # v5e/v6e (128 MiB) and v7x (64 MiB): ~1.5 MiB total at tb=512.
    tb = min(block_b, _round_up(B, 8))
    b_p = _round_up(B, tb)

    neg = jnp.float32(-1e30)  # masks padded class logits out of the softmax

    x_p = jnp.zeros((b_p, in_p), jnp.bfloat16).at[:B, :input_dim].set(
        x.astype(jnp.bfloat16))
    w1_p = jnp.zeros((in_p, hid_p), jnp.bfloat16).at[:input_dim, :hidden_dim].set(
        w1.astype(jnp.bfloat16))
    b1_p = jnp.zeros((1, hid_p), jnp.float32).at[0, :hidden_dim].set(
        b1.astype(jnp.float32))
    w2_p = jnp.zeros((hid_p, cls_p), jnp.float32).at[:hidden_dim, :n_classes].set(
        w2.astype(jnp.float32))
    b2_p = jnp.full((1, cls_p), neg, jnp.float32).at[0, :n_classes].set(
        b2.astype(jnp.float32))

    out = pl.pallas_call(
        _mlp_logsoftmax_kernel,
        out_shape=jax.ShapeDtypeStruct((b_p, cls_p), jnp.float32),
        grid_spec=pl.GridSpec(
            grid=(b_p // tb,),
            in_specs=[
                pl.BlockSpec((tb, in_p), lambda i: (i, 0)),      # x: pipelined per tile
                pl.BlockSpec((in_p, hid_p), lambda i: (0, 0)),   # W1: VMEM-resident
                pl.BlockSpec((1, hid_p), lambda i: (0, 0)),      # b1
                pl.BlockSpec((hid_p, cls_p), lambda i: (0, 0)),  # W2
                pl.BlockSpec((1, cls_p), lambda i: (0, 0)),      # b2 (padded to -1e30)
            ],
            out_specs=pl.BlockSpec((tb, cls_p), lambda i: (i, 0)),
        ),
        compiler_params=pltpu.CompilerParams(
            dimension_semantics=("parallel",),
        ),
    )(x_p, w1_p, b1_p, w2_p, b2_p)

    # Strip batch padding and the padded class lanes.
    return out[:B, :n_classes]


if __name__ == "__main__":
    # Small shapes consistent with the module: input_dim (embedding dim) = 32,
    # hidden_dim = 32, 2 output classes, batch = 8.
    # TODO(synk): word-embedding lookup + averaging (forward steps 1-2) happen
    # outside the kernel; x here is the already-averaged embedding per example.
    batch, input_dim, hidden_dim, n_classes = 8, 32, 32, 2

    key = jax.random.PRNGKey(0)
    kx, kw1, kb1, kw2, kb2 = jax.random.split(key, 5)

    x = jax.random.normal(kx, (batch, input_dim), dtype=jnp.float32)
    w1 = jax.random.normal(kw1, (input_dim, hidden_dim), dtype=jnp.float32) * 0.1
    b1 = jax.random.normal(kb1, (hidden_dim,), dtype=jnp.float32) * 0.1
    w2 = jax.random.normal(kw2, (hidden_dim, n_classes), dtype=jnp.float32) * 0.1
    b2 = jax.random.normal(kb2, (n_classes,), dtype=jnp.float32) * 0.1

    out = neural_net_forward(x, w1, b1, w2, b2)
    jax.block_until_ready(out)

    # Reference check in plain f32 JAX (kernel uses bf16 for the first matmul,
    # so the tolerance is relaxed accordingly).
    h_ref = jnp.maximum(x @ w1 + b1, 0.0)
    logits_ref = h_ref @ w2 + b2
    ref = jax.nn.log_softmax(logits_ref, axis=1)
    assert out.shape == (batch, n_classes)
    assert jnp.allclose(out, ref, atol=2e-2), "mismatch vs reference"

    print("KERNEL_OK")
</pallas_src>

<mosaic_0001>
module attributes {stable_mosaic.version = 11 : i64} {
  func.func @_mlp_logsoftmax_kernel(%arg0: i32, %arg1: memref<8x128xbf16, #tpu.memory_space<vmem>>, %arg2: memref<128x128xbf16, #tpu.memory_space<vmem>>, %arg3: memref<1x128xf32, #tpu.memory_space<vmem>>, %arg4: memref<128x128xf32, #tpu.memory_space<vmem>>, %arg5: memref<1x128xf32, #tpu.memory_space<vmem>>, %arg6: memref<8x128xf32, #tpu.memory_space<vmem>>) attributes {dimension_semantics = [#tpu.dimension_semantics<parallel>], iteration_bounds = array<i64: 1>, scalar_prefetch = 0 : i64, scratch_operands = 0 : i64, tpu.core_type = #tpu.core_type<tc>, window_params = [{transform_indices = @transform_0, window_bounds = array<i64: 8, 128>}, {pipeline_mode = #tpu.pipeline_mode<synchronous>, transform_indices = @transform_1, window_bounds = array<i64: 128, 128>}, {pipeline_mode = #tpu.pipeline_mode<synchronous>, transform_indices = @transform_2, window_bounds = array<i64: 1, 128>}, {pipeline_mode = #tpu.pipeline_mode<synchronous>, transform_indices = @transform_3, window_bounds = array<i64: 128, 128>}, {pipeline_mode = #tpu.pipeline_mode<synchronous>, transform_indices = @transform_4, window_bounds = array<i64: 1, 128>}, {transform_indices = @transform_5, window_bounds = array<i64: 8, 128>}]} {
    %c0 = arith.constant 0 : index
    %c0_0 = arith.constant 0 : index
    %0 = vector.load %arg1[%c0, %c0_0] : memref<8x128xbf16, #tpu.memory_space<vmem>>, vector<8x128xbf16>
    %c0_1 = arith.constant 0 : index
    %c0_2 = arith.constant 0 : index
    %1 = vector.load %arg2[%c0_1, %c0_2] : memref<128x128xbf16, #tpu.memory_space<vmem>>, vector<128x128xbf16>
    %cst = arith.constant dense<0.000000e+00> : vector<8x128xf32>
    %2 = tpu.matmul %0, %1, %cst {dimension_numbers = #tpu.dot_dimension_numbers<[1], [0], [0], [1], [0, 0, 1, 1], [], []>} : vector<8x128xbf16>, vector<128x128xbf16>, vector<8x128xf32> -> vector<8x128xf32>
    %c0_3 = arith.constant 0 : index
    %c0_4 = arith.constant 0 : index
    %3 = vector.load %arg3[%c0_3, %c0_4] : memref<1x128xf32, #tpu.memory_space<vmem>>, vector<1x128xf32>
    %4 = vector.broadcast %3 : vector<1x128xf32> to vector<8x128xf32>
    %5 = arith.addf %2, %4 : vector<8x128xf32>
    %cst_5 = arith.constant 0.000000e+00 : f32
    %6 = vector.broadcast %cst_5 : f32 to vector<8x128xf32>
    %7 = arith.maximumf %5, %6 : vector<8x128xf32>
    %c0_6 = arith.constant 0 : index
    %c0_7 = arith.constant 0 : index
    %8 = vector.load %arg4[%c0_6, %c0_7] : memref<128x128xf32, #tpu.memory_space<vmem>>, vector<128x128xf32>
    %cst_8 = arith.constant dense<0.000000e+00> : vector<8x128xf32>
    %9 = tpu.matmul %7, %8, %cst_8 {dimension_numbers = #tpu.dot_dimension_numbers<[1], [0], [0], [1], [0, 0, 1, 1], [], []>} : vector<8x128xf32>, vector<128x128xf32>, vector<8x128xf32> -> vector<8x128xf32>
    %c0_9 = arith.constant 0 : index
    %c0_10 = arith.constant 0 : index
    %10 = vector.load %arg5[%c0_9, %c0_10] : memref<1x128xf32, #tpu.memory_space<vmem>>, vector<1x128xf32>
    %11 = vector.broadcast %10 : vector<1x128xf32> to vector<8x128xf32>
    %12 = arith.addf %9, %11 : vector<8x128xf32>
    %cst_11 = arith.constant dense<0xFF800000> : vector<8xf32>
    %13 = vector.multi_reduction <maximumf>, %12, %cst_11 [1] : vector<8x128xf32> to vector<8xf32>
    %14 = vector.shape_cast %13 : vector<8xf32> to vector<8x1xf32>
    %15 = vector.broadcast %14 : vector<8x1xf32> to vector<8x128xf32>
    %16 = arith.subf %12, %15 : vector<8x128xf32>
    %17 = math.exp %16 : vector<8x128xf32>
    %cst_12 = arith.constant dense<0.000000e+00> : vector<8xf32>
    %18 = vector.multi_reduction <add>, %17, %cst_12 [1] : vector<8x128xf32> to vector<8xf32>
    %19 = vector.shape_cast %18 : vector<8xf32> to vector<8x1xf32>
    %20 = math.log %19 : vector<8x1xf32>
    %21 = vector.broadcast %20 : vector<8x1xf32> to vector<8x128xf32>
    %22 = arith.subf %16, %21 : vector<8x128xf32>
    %c0_13 = arith.constant 0 : index
    %c0_14 = arith.constant 0 : index
    %23 = vector.load %arg6[%c0_13, %c0_14] : memref<8x128xf32, #tpu.memory_space<vmem>>, vector<8x128xf32>
    tpu.vector_store %arg6[%c0_13, %c0_14], %22 {strides = array<i32>} : memref<8x128xf32, #tpu.memory_space<vmem>>, vector<8x128xf32>,
    return
  }
  func.func @transform_0(%arg0: i32) -> (i32, i32) {
    %c0_i32 = arith.constant 0 : i32
    %c0_i32_0 = arith.constant 0 : i32
    return %arg0, %c0_i32 : i32, i32
  }
  func.func @transform_1(%arg0: i32) -> (i32, i32) {
    %c0_i32 = arith.constant 0 : i32
    %c0_i32_0 = arith.constant 0 : i32
    %c0_i32_1 = arith.constant 0 : i32
    return %c0_i32, %c0_i32_0 : i32, i32
  }
  func.func @transform_2(%arg0: i32) -> (i32, i32) {
    %c0_i32 = arith.constant 0 : i32
    %c0_i32_0 = arith.constant 0 : i32
    %c0_i32_1 = arith.constant 0 : i32
    return %c0_i32, %c0_i32_0 : i32, i32
  }
  func.func @transform_3(%arg0: i32) -> (i32, i32) {
    %c0_i32 = arith.constant 0 : i32
    %c0_i32_0 = arith.constant 0 : i32
    %c0_i32_1 = arith.constant 0 : i32
    return %c0_i32, %c0_i32_0 : i32, i32
  }
  func.func @transform_4(%arg0: i32) -> (i32, i32) {
    %c0_i32 = arith.constant 0 : i32
    %c0_i32_0 = arith.constant 0 : i32
    %c0_i32_1 = arith.constant 0 : i32
    return %c0_i32, %c0_i32_0 : i32, i32
  }
  func.func @transform_5(%arg0: i32) -> (i32, i32) {
    %c0_i32 = arith.constant 0 : i32
    %c0_i32_0 = arith.constant 0 : i32
    return %arg0, %c0_i32 : i32, i32
  }
}

</mosaic_0001>

<bundles_post_ra>
// kernel: tpu_custom_call.1
= control target key start
LH: loop header
LB: loop body
LE: loop exit
PB: predicated region body
PF: predicated region fallthrough
CT: control target
= control target key end

     0   :  { %10 = vsyncpa [#allocation3], 0  ;;  %s577_s0 = inlined_call_operand.hbm [shape: bf16[8,128], index: 0, kind: input, shape index: {}]   ;;  %s578_s1 = inlined_call_operand.hbm [shape: bf16[128,128], index: 1, kind: input, shape index: {}]   ;;  %s579_s2 = inlined_call_operand.vmem [shape: f32[1,128], index: 2, kind: input, shape index: {}]   ;;  %s580_s3 = inlined_call_operand.hbm [shape: f32[128,128], index: 3, kind: input, shape index: {}]   ;;  %s581_s4 = inlined_call_operand.vmem [shape: f32[1,128], index: 4, kind: input, shape index: {}]   ;;  %s582_s5 = inlined_call_operand.hbm [shape: f32[8,128], index: 5, kind: output, shape index: {}]  }
   0x1   :  { %11 = vsyncpa [#allocation6], 0 }
   0x2   :  { %12 = vsyncpa [#allocation4], 0  ;;  %s493_s18 = smov [#allocation5]  }
   0x3   :  { %s28_s19 = sshll.u32 %s493_s18, 4  ;;  %s29_s19 = int_to_ptr.vmem [resolvable:$true] %s28_s19 }
   0x4   :  { %s415_s20 = scalar_lea.vmem %s29_s19, 1024  ;;  %p420_p1 = scmp.lt.s32.totalorder %s29_s19, %s29_s19 }
   0x5   :  { %p416_p0 = scmp.ne.s32.totalorder %s29_s19, %s415_s20  ;;  %p421_p2 = scmp.lt.s32.totalorder %s415_s20, %s415_s20 }
   0x7   :  { %p422_p3 = por %p421_p2, %p420_p1 }
   0x9   :  { %p423_p4 = pnand %p422_p3, %p416_p0 }
   0xb   :  { %426 = shalt.err (!%p423_p4)
}
   0xc   :  { %s494_s21 = smov 64   ;;  %s495_s22 = smov 4  }
   0xd   :  { %34 = dma.hbm_to_vmem [thread:$0]  %s578_s1, 1024, %s29_s19, [#allocation6], %s494_s21, %s494_s21, %s495_s22  }
   0xe   :  { %s496_s25 = smov [#allocation2]   ;;  %s497_s27 = smov [#allocation7]  }
   0xf   :  { %s19_s26 = sshll.u32 %s496_s25, 4  ;;  %s42_s28 = sshll.u32 %s497_s27, 4  ;;  %s20_s26 = int_to_ptr.vmem [resolvable:$true] %s19_s26  ;;  %s43_s28 = int_to_ptr.vmem [resolvable:$true] %s42_s28 }
  0x10   :  { %s435_s29 = scalar_lea.vmem %s20_s26, 64  ;;  %p440_p6 = scmp.lt.s32.totalorder %s20_s26, %s20_s26 }
  0x11   :  { %p436_p5 = scmp.ne.s32.totalorder %s20_s26, %s435_s29  ;;  %p441_p7 = scmp.lt.s32.totalorder %s435_s29, %s435_s29 }
  0x13   :  { %p442_p8 = por %p441_p7, %p440_p6 }
  0x15   :  { %p443_p9 = pnand %p442_p8, %p436_p5 }
  0x17   :  { %446 = shalt.err (!%p443_p9)
}
  0x18   :  { %22 = dma.hbm_to_vmem [thread:$0]  %s577_s0, 64, %s20_s26, [#allocation3]  }
  0x19   :  { %s455_s7 = scalar_lea.vmem %s43_s28, 2048  ;;  %p460_p11 = scmp.lt.s32.totalorder %s43_s28, %s43_s28 }
  0x1a   :  { %p456_p10 = scmp.ne.s32.totalorder %s43_s28, %s455_s7  ;;  %p461_p12 = scmp.lt.s32.totalorder %s455_s7, %s455_s7 }
  0x1c   :  { %p462_p13 = por %p461_p12, %p460_p11 }
  0x1e   :  { %p463_p0 = pnand %p462_p13, %p456_p10 }
  0x20   :  { %466 = shalt.err (!%p463_p0)
}
  0x21   :  { %s498_s1 = smov 128   ;;  %s499_s8 = smov 8  }
  0x22   :  { %48 = dma.hbm_to_vmem [thread:$0]  %s580_s3, 2048, %s43_s28, [#allocation6], %s498_s1, %s498_s1, %s499_s8  }
  0x23   :  { %487 = dma.done.wait [#allocation3], 64  }
  0x24   :  { %488 = vsyncadd [#allocation3], 4294967232 }
  0x25   :  { %489 = dma.done.wait [#allocation6], 3072  }
  0x26   :  { %490 = vsyncadd [#allocation6], 4294964224  ;;  %v500_v0 = vmov 0.0   ;;  %vm501_vm0 = vmmov 0   ;;  %v395_v1 = vld [vmem:[#allocation5 + $0x38] sm:$0xff]   ;;  %v396_v2 = vld [vmem:[#allocation5 + $0x30] sm:$0xff]  }
  0x27   :  { %330 = vmatprep.subr.bf16.mxu0 %v500_v0  ;;  %346 = vmatprep.mubr.msk.bf16.mxu0 %vm501_vm0, %v500_v0  ;;  %v397_v3 = vld [vmem:[#allocation5 + $0x28] sm:$0xff]   ;;  %v189_v4 = vld [vmem:[#allocation7 + $0x78] sm:$0xff]  ;;  %v188_v5 = vld [vmem:[#allocation7 + $0x70] sm:$0xff] }
  0x28   :  { %350 = vmatprep.subr.mxu1 %v500_v0  ;;  %382 = vmatprep.mubr.msk.f32.mxu1 %vm501_vm0, %v500_v0  ;;  %v398_v6 = vld [vmem:[#allocation5 + $0x20] sm:$0xff]   ;;  %v187_v7 = vld [vmem:[#allocation7 + $0x68] sm:$0xff]  ;;  %v399_v9 = vld [vmem:[#allocation5 + $0x18] sm:$0xff]  }
  0x29   :  { %331 = vmatpush3.bf16.msra.mxu0 %v395_v1  ;;  %351 = vmatpush3.msra.mxu1 %v189_v4  ;;  %v186_v8 = vld [vmem:[#allocation7 + $0x60] sm:$0xff]  ;;  %v185_v10 = vld [vmem:[#allocation7 + $0x58] sm:$0xff]  ;;  %v184_v11 = vld [vmem:[#allocation7 + $0x50] sm:$0xff] }
  0x2a   :  { %332 = vmatprep.subr.bf16.mxu0 %v500_v0  ;;  %352 = vmatprep.subr.mxu1 %v500_v0  ;;  %v400_v12 = vld [vmem:[#allocation5 + $0x10] sm:$0xff]   ;;  %v183_v13 = vld [vmem:[#allocation7 + $0x48] sm:$0xff]  ;;  %v182_v14 = vld [vmem:[#allocation7 + $0x40] sm:$0xff] }
  0x2b   :  { %353 = vmatpush3.msra.mxu1 %v188_v5  ;;  %v401_v15 = vld [vmem:[#allocation5 + $0x8] sm:$0xff]   ;;  %v181_v16 = vld [vmem:[#allocation7 + $0x38] sm:$0xff]  ;;  %v180_v17 = vld [vmem:[#allocation7 + $0x30] sm:$0xff] }
  0x2c   :  { %354 = vmatprep.subr.mxu1 %v500_v0  ;;  %v402_v18 = vld [vmem:[#allocation5] sm:$0xff]   ;;  %v179_v19 = vld [vmem:[#allocation7 + $0x28] sm:$0xff]  ;;  %v61_v21 = vld [vmem:[#allocation2] sm:$0xf] }
  0x2d   :  { %333 = vmatpush3.bf16.msra.mxu0 %v396_v2  ;;  %355 = vmatpush3.msra.mxu1 %v187_v7  ;;  %v178_v20 = vld [vmem:[#allocation7 + $0x20] sm:$0xff]  ;;  %v177_v22 = vld [vmem:[#allocation7 + $0x18] sm:$0xff]  ;;  %v176_v23 = vld [vmem:[#allocation7 + $0x10] sm:$0xff] }
  0x2e   :  { %334 = vmatprep.subr.bf16.mxu0 %v500_v0  ;;  %356 = vmatprep.subr.mxu1 %v500_v0  ;;  %v175_v24 = vld [vmem:[#allocation7 + $0x8] sm:$0xff]  ;;  %v174_v25 = vld [vmem:[#allocation7] sm:$0xff]  ;;  %v294_v26 = vld [vmem:[%s579_s2] ss:$0 sm:$0xff]  ;;  %s502_s2 = smov [#allocation8]  }
  0x2f   :  { %357 = vmatpush3.msra.mxu1 %v186_v8  ;;  %v303_v33 = vld [vmem:[%s581_s4] ss:$0 sm:$0xff]  ;;  %s284_s13 = sshll.u32 %s502_s2, 4  ;;  %s285_s13 = int_to_ptr.vmem [resolvable:$true] %s284_s13 }
  0x30   :  { %358 = vmatprep.subr.mxu1 %v500_v0  ;;  %s467_s4 = scalar_lea.vmem %s285_s13, 128  ;;  %p472_p2 = scmp.lt.s32.totalorder %s285_s13, %s285_s13 }
  0x31   :  { %335 = vmatpush3.bf16.msra.mxu0 %v397_v3  ;;  %359 = vmatpush3.msra.mxu1 %v185_v10  ;;  %p468_p1 = scmp.ne.s32.totalorder %s285_s13, %s467_s4  ;;  %p473_p3 = scmp.lt.s32.totalorder %s467_s4, %s467_s4 }
  0x32   :  { %336 = vmatprep.subr.bf16.mxu0 %v500_v0  ;;  %360 = vmatprep.subr.mxu1 %v500_v0 }
  0x33   :  { %361 = vmatpush3.msra.mxu1 %v184_v11  ;;  %p474_p4 = por %p473_p3, %p472_p2 }
  0x34   :  { %362 = vmatprep.subr.mxu1 %v500_v0 }
  0x35   :  { %337 = vmatpush3.bf16.msra.mxu0 %v398_v6  ;;  %363 = vmatpush3.msra.mxu1 %v183_v13  ;;  %p475_p5 = pnand %p474_p4, %p468_p1 }
  0x36   :  { %338 = vmatprep.subr.bf16.mxu0 %v500_v0  ;;  %364 = vmatprep.subr.mxu1 %v500_v0 }
  0x37   :  { %365 = vmatpush3.msra.mxu1 %v182_v14 }
  0x38   :  { %366 = vmatprep.subr.mxu1 %v500_v0 }
  0x39   :  { %339 = vmatpush3.bf16.msra.mxu0 %v399_v9  ;;  %367 = vmatpush3.msra.mxu1 %v181_v16 }
  0x3a   :  { %340 = vmatprep.subr.bf16.mxu0 %v500_v0  ;;  %368 = vmatprep.subr.mxu1 %v500_v0 }
  0x3b   :  { %369 = vmatpush3.msra.mxu1 %v180_v17 }
  0x3c   :  { %370 = vmatprep.subr.mxu1 %v500_v0 }
  0x3d   :  { %341 = vmatpush3.bf16.msra.mxu0 %v400_v12  ;;  %371 = vmatpush3.msra.mxu1 %v179_v19 }
  0x3e   :  { %342 = vmatprep.subr.bf16.mxu0 %v500_v0  ;;  %372 = vmatprep.subr.mxu1 %v500_v0 }
  0x3f   :  { %373 = vmatpush3.msra.mxu1 %v178_v20 }
  0x40   :  { %374 = vmatprep.subr.mxu1 %v500_v0 }
  0x41   :  { %343 = vmatpush3.bf16.msra.mxu0 %v401_v15  ;;  %375 = vmatpush3.msra.mxu1 %v177_v22 }
  0x42   :  { %344 = vmatprep.subr.bf16.mxu0 %v500_v0  ;;  %376 = vmatprep.subr.mxu1 %v500_v0 }
  0x43   :  { %377 = vmatpush3.msra.mxu1 %v176_v23 }
  0x44   :  { %378 = vmatprep.subr.mxu1 %v500_v0 }
  0x45   :  { %345 = vmatpush3.bf16.msra.mxu0 %v402_v18  ;;  %379 = vmatpush3.msra.mxu1 %v175_v24 }
  0x46   :  { %380 = vmatprep.subr.mxu1 %v500_v0 }
  0x47   :  { %381 = vmatpush3.msra.mxu1 %v174_v25 }
  0x48   :  { %347 = vmatmul.mubr.bf16.vlgmr.msra.gmra.mxu0 %v61_v21 }
 0x108   :  { %v167_v27 = vpop.f32.mrf.mxu0 }
 0x109   :  { %v168_v28 = vadd.f32 %v294_v26, %v167_v27 }
 0x10a   :  { %v348_v29 = vpop.f32.mrf.mxu0 }
 0x10b   :  { %v173_v30 = vmax.f32 %v168_v28, 0.0 }
 0x10c   :  { %v170_v31 = vpop.f32.mrf.mxu0 }
 0x10d   :  { %383 = vmatmul.mubr.f32.vlgmr.msra.gmra.mxu1 %v173_v30 }
 0x10e   :  { %v349_v32 = vpop.f32.mrf.mxu0 }
 0x1cd   :  { %v263_v34 = vpop.f32.mrf.mxu1 }
 0x1ce   :  { %v264_v35 = vadd.f32 %v303_v33, %v263_v34 }
 0x1cf   :  { %v384_v36 = vpop.f32.mrf.mxu1 }
 0x1d0   :  { %267 = vmax.xlane.f32.xlu0 %v264_v35 }
 0x259   :  { %v268_v37 = vpop.xlane.xlu0 %267 }
 0x25a   :  { %v269_v38 = vsub.f32 %v264_v35, %v268_v37 }
 0x25c   :  { %v270_v39 = vmul.f32 1.442695, %v269_v38 }
 0x25e   :  { %403 = vpow2.f32 %v270_v39 }
 0x26b   :  { %v404_v40 = vpop.eup %403 }
 0x26c   :  { %272 = vadd.xlane.f32.xlu0 %v404_v40 }
 0x2f5   :  { %v273_v41 = vpop.xlane.xlu0 %272 }
 0x2f6   :  { %405 = vlog2.f32 %v273_v41 }
 0x303   :  { %v406_v42 = vpop.eup %405 }
 0x304   :  { %v275_v43 = vmul.f32 0.6931472, %v406_v42 }
 0x306   :  { %v276_v44 = vsub.f32 %v269_v38, %v275_v43 }
 0x308   :  { %277 = vst [vmem:[#allocation8] sm:$0xff] %v276_v44 }
 0x309   :  { %478 = shalt.err (!%p475_p5)
}
 0x30a   :  { %287 = dma.vmem_to_hbm [thread:$0]  %s285_s13, 128, %s582_s5, [#allocation4]  }
 0x30b   :  { %491 = dma.done.wait [#allocation4], 128  }
 0x30c   :  { %492 = vsyncadd [#allocation4], 4294967168 }
 0x30d   :  { %291 = vsyncpa [#allocation3], 1 }
 0x30e   :  { %292 = vsyncpa [#allocation6], 1 }
 0x30f   :  { %293 = vsyncpa [#allocation4], 1 }

</bundles_post_ra>
